<compile_context>
chip_gen: v6e
topology: v6e:2x2x1
jax: 0.10.0
libtpu: 0.0.40
codegen_flags: <defaults>
</compile_context>

<pallas_src>
import functools

import jax
import jax.numpy as jnp
from jax.experimental import pallas as pl
from jax.experimental.pallas import tpu as pltpu

LANE = 128      # vreg lane width: feature dims padded to multiples of this
SUBLANE = 8     # vreg sublane width: node-dim granularity for the fused path


# ---------------------------------------------------------------------------
# Small helpers
# ---------------------------------------------------------------------------
def _round_up(x, m):
    return (x + m - 1) // m * m


def _pad2(a, rows, cols):
    r, c = a.shape
    return jnp.pad(a, ((0, rows - r), (0, cols - c)))


@functools.lru_cache(maxsize=None)
def _vmem_capacity_bytes():
    try:
        cap = getattr(pltpu.get_tpu_info(), "vmem_capacity_bytes", None)
        if cap:
            return int(cap)
    except Exception:
        pass
    return 128 << 20          # v5e/v6e default if query unavailable


def _vmem_limit_bytes():
    # ~75% of per-core VMEM leaves headroom for Mosaic internal scratch on
    # every generation (48 MiB on v7x, 96 MiB on v5e/v6e).
    return (3 * _vmem_capacity_bytes()) // 4


@functools.lru_cache(maxsize=None)
def _row_axis_semantics():
    # Only CORE_PARALLEL actually shards a grid axis across v7x's two
    # TensorCores; plain "parallel" vs "arbitrary" is a near-no-op, so gate
    # the enum by chip generation (v5e/v6e have one TC).
    try:
        kind = jax.devices()[0].device_kind.lower()
    except Exception:
        kind = ""
    return pltpu.CORE_PARALLEL if "v7" in kind else "parallel"


# ---------------------------------------------------------------------------
# Kernels
# ---------------------------------------------------------------------------
def _gcn_agg_body(nnz_ref, adj_ref, feat_ref, w_ref, b_ref, out_ref, acc_ref,
                  apply_relu):
    """One (row-stripe i, K-block j) step of  out = A_hat @ feat [@ W] + b."""
    j = pl.program_id(1)

    @pl.when(j == 0)
    def _():
        acc_ref[...] = jnp.zeros_like(acc_ref)

    # Block-sparse skip: kmap repeats the last nonzero block index for
    # j >= nnz[i], so the DMA for all-zero blocks is elided by the pipeline;
    # here we also gate off the (useless) MXU work.
    @pl.when(j < nnz_ref[pl.program_id(0)])
    def _():
        acc_ref[...] += jnp.dot(adj_ref[...], feat_ref[...],
                                preferred_element_type=jnp.float32)

    @pl.when(j == pl.num_programs(1) - 1)
    def _():
        acc = acc_ref[...]
        if w_ref is not None:                               # aggregate-first
            out = jnp.dot(acc, w_ref[...],
                          preferred_element_type=jnp.float32) + b_ref[...]
        else:                                               # transform-first
            out = acc + b_ref[...]
        if apply_relu:
            out = jnp.maximum(out, 0.0)
        out_ref[...] = out.astype(out_ref.dtype)


def _make_agg_kernel(apply_relu, has_w):
    if has_w:
        def kernel(kmap_ref, nnz_ref, adj_ref, feat_ref, w_ref, b_ref,
                   out_ref, acc_ref):
            del kmap_ref   # only used in the index maps
            _gcn_agg_body(nnz_ref, adj_ref, feat_ref, w_ref, b_ref,
                          out_ref, acc_ref, apply_relu)
    else:
        def kernel(kmap_ref, nnz_ref, adj_ref, feat_ref, b_ref,
                   out_ref, acc_ref):
            del kmap_ref
            _gcn_agg_body(nnz_ref, adj_ref, feat_ref, None, b_ref,
                          out_ref, acc_ref, apply_relu)
    return kernel


def _xw_kernel(x_ref, w_ref, o_ref):
    """Row-tiled XW = x @ W (transform-first precompute)."""
    o_ref[...] = jnp.dot(x_ref[...], w_ref[...].astype(x_ref.dtype),
                         preferred_element_type=jnp.float32).astype(o_ref.dtype)


def gcn_two_layer_kernel(adj_ref, x_ref, w1_ref, b1_ref, w2_ref, b2_ref, out_ref):
    """Both GCN layers fused in one kernel invocation (small graphs).

    out = A @ relu(A @ (x @ W1) + b1) @ W2 + b2   (dropout = eval identity)
    Layer 1 is transform-first (f_in >= hidden is the typical GCN case).
    """
    adj = adj_ref[...]
    xw = jnp.dot(x_ref[...], w1_ref[...].astype(x_ref.dtype),
                 preferred_element_type=jnp.float32)
    h = jnp.dot(adj, xw.astype(adj.dtype),
                preferred_element_type=jnp.float32) + b1_ref[...]
    h = jnp.maximum(h, 0.0)
    # F.dropout(p=0.5, training=False) -> identity.
    ah = jnp.dot(adj, h.astype(adj.dtype), preferred_element_type=jnp.float32)
    out = jnp.dot(ah, w2_ref[...], preferred_element_type=jnp.float32) + b2_ref[...]
    out_ref[...] = out.astype(out_ref.dtype)


# ---------------------------------------------------------------------------
# pallas_call wrappers
# ---------------------------------------------------------------------------
def _transform(x, w, *, tile, out_dtype):
    """XW = x @ W, row-tiled (full K resident)."""
    m, k = x.shape
    _, n = w.shape
    return pl.pallas_call(
        _xw_kernel,
        out_shape=jax.ShapeDtypeStruct((m, n), out_dtype),
        grid_spec=pltpu.PrefetchScalarGridSpec(
            num_scalar_prefetch=0,
            grid=(m // tile,),
            in_specs=[pl.BlockSpec((tile, k), lambda i: (i, 0)),
                      pl.BlockSpec((k, n), lambda i: (0, 0))],
            out_specs=pl.BlockSpec((tile, n), lambda i: (i, 0)),
        ),
        compiler_params=pltpu.CompilerParams(
            dimension_semantics=(_row_axis_semantics(),),
            vmem_limit_bytes=_vmem_limit_bytes(),
        ),
    )(x, w)


def _aggregate(adj, feat, w, b, kmap, nnz, *, apply_relu, tile, out_dtype):
    """(Row, K)-tiled, block-sparse  out = A_hat @ feat [@ W] + b."""
    n = adj.shape[0]
    f_feat = feat.shape[1]
    has_w = w is not None
    f_out = w.shape[1] if has_w else f_feat
    nr = n // tile
    nk = n // tile

    in_specs = [
        # A_hat (tile, tile): column-block index goes through kmap so that
        # nonzero blocks come first and all-zero blocks repeat the previous
        # index (=> no DMA for them).
        pl.BlockSpec((tile, tile),
                     lambda i, j, kmap_ref, nnz_ref: (i, kmap_ref[i * nk + j])),
        # matching feature row-block
        pl.BlockSpec((tile, f_feat),
                     lambda i, j, kmap_ref, nnz_ref: (kmap_ref[i * nk + j], 0)),
    ]
    operands = [adj, feat]
    if has_w:
        in_specs.append(pl.BlockSpec((f_feat, f_out),
                                     lambda i, j, kmap_ref, nnz_ref: (0, 0)))
        operands.append(w)
    in_specs.append(pl.BlockSpec((1, f_out),
                                 lambda i, j, kmap_ref, nnz_ref: (0, 0)))
    operands.append(b.reshape(1, f_out))

    return pl.pallas_call(
        _make_agg_kernel(apply_relu, has_w),
        out_shape=jax.ShapeDtypeStruct((n, f_out), out_dtype),
        grid_spec=pltpu.PrefetchScalarGridSpec(
            num_scalar_prefetch=2,                      # kmap (flat), nnz
            grid=(nr, nk),                              # K (reduction) last
            in_specs=in_specs,
            out_specs=pl.BlockSpec((tile, f_out),
                                   lambda i, j, kmap_ref, nnz_ref: (i, 0)),
            scratch_shapes=[pltpu.VMEM((tile, f_feat), jnp.float32)],
        ),
        compiler_params=pltpu.CompilerParams(
            dimension_semantics=(_row_axis_semantics(), "arbitrary"),
            vmem_limit_bytes=_vmem_limit_bytes(),
        ),
    )(kmap, nnz, *operands)


def gcn_conv(adj, feat, w, b, kmap, nnz, *, apply_relu, tile, input_dtype,
             out_dtype):
    """One GCNConv layer (tiled path), picking transform- vs aggregate-first."""
    f_in, f_out = feat.shape[1], w.shape[1]
    if f_in > f_out:
        # Transform-first: one XW pass, then aggregate the (N, f_out) operand.
        xw = _transform(feat, w, tile=tile, out_dtype=input_dtype)
        return _aggregate(adj, xw, None, b, kmap, nnz,
                          apply_relu=apply_relu, tile=tile, out_dtype=out_dtype)
    return _aggregate(adj, feat, w, b, kmap, nnz,
                      apply_relu=apply_relu, tile=tile, out_dtype=out_dtype)


def _two_layer_fused_call(adj, x, w1, b1, w2, b2):
    """Single pallas_call for the whole 2-layer forward (everything in VMEM)."""
    n = adj.shape[0]
    f_in, h_dim, c_out = x.shape[1], w1.shape[1], w2.shape[1]
    return pl.pallas_call(
        gcn_two_layer_kernel,
        out_shape=jax.ShapeDtypeStruct((n, c_out), jnp.float32),
        grid_spec=pltpu.PrefetchScalarGridSpec(
            num_scalar_prefetch=0,
            grid=(1,),
            in_specs=[
                pl.BlockSpec((n, n), lambda i: (0, 0)),
                pl.BlockSpec((n, f_in), lambda i: (0, 0)),
                pl.BlockSpec((f_in, h_dim), lambda i: (0, 0)),
                pl.BlockSpec((1, h_dim), lambda i: (0, 0)),
                pl.BlockSpec((h_dim, c_out), lambda i: (0, 0)),
                pl.BlockSpec((1, c_out), lambda i: (0, 0)),
            ],
            out_specs=pl.BlockSpec((n, c_out), lambda i: (0, 0)),
        ),
        compiler_params=pltpu.CompilerParams(
            vmem_limit_bytes=_vmem_limit_bytes()),
    )(adj, x, w1, b1.reshape(1, h_dim), w2, b2.reshape(1, c_out))


# ---------------------------------------------------------------------------
# Padding, block-sparsity map, tile selection
# ---------------------------------------------------------------------------
def _prepare_padded(a_hat, x, params, *, n_multiple, input_dtype):
    """Zero-pad node dim to n_multiple and feature dims to 128 lanes."""
    w1, b1, w2, b2 = params
    n = x.shape[0]
    n_pad = _round_up(n, n_multiple)
    f_in_p = _round_up(x.shape[1], LANE)
    h_p = _round_up(w1.shape[1], LANE)
    c_p = _round_up(w2.shape[1], LANE)
    adj_p = _pad2(a_hat, n_pad, n_pad).astype(input_dtype)
    x_p = _pad2(x, n_pad, f_in_p).astype(input_dtype)
    w1_p = _pad2(w1, f_in_p, h_p).astype(jnp.float32)
    b1_p = jnp.pad(b1, (0, h_p - b1.shape[0])).astype(jnp.float32)
    w2_p = _pad2(w2, h_p, c_p).astype(jnp.float32)
    b2_p = jnp.pad(b2, (0, c_p - b2.shape[0])).astype(jnp.float32)
    return adj_p, x_p, w1_p, b1_p, w2_p, b2_p


def _block_sparsity(adj_p, tile):
    """kmap (flattened, nonzero-blocks-first column order per row stripe) and
    per-stripe nonzero-block counts nnz."""
    nb = adj_p.shape[0] // tile
    blocks = adj_p.reshape(nb, tile, nb, tile)
    nonzero = (blocks != 0).any(axis=(1, 3))                         # (nb, nb)
    order = jnp.argsort(jnp.where(nonzero, 0, 1).astype(jnp.int32), axis=1)
    nnz = nonzero.sum(axis=1).astype(jnp.int32)                      # (nb,)
    pos = jnp.minimum(jnp.arange(nb, dtype=jnp.int32)[None, :],
                      jnp.maximum(nnz - 1, 0)[:, None])
    kmap = jnp.take_along_axis(order, pos, axis=1).astype(jnp.int32)
    return kmap.reshape(-1), nnz                                     # 1D for SMEM


def _pick_tile(n, requested, f_feat_max, f_out_max, in_item):
    """Node tile (rows and K-blocks): multiple of 128, sized to the chip's VMEM."""
    cap = _vmem_capacity_bytes()
    budget = (3 * cap) // 4
    tile = requested if requested is not None else (512 if cap >= (100 << 20) else 256)
    tile = min(tile, _round_up(n, LANE))
    tile = max(LANE, _round_up(tile, LANE))
    while True:
        need = (2 * (tile * tile * in_item            # A block (double-buffered)
                     + tile * f_feat_max * in_item    # feat block
                     + tile * f_out_max * 4)          # out block
                + f_feat_max * f_out_max * 4          # resident W
                + tile * f_feat_max * 4               # f32 accumulator scratch
                + tile * f_out_max * 4                # finalize intermediate
                + (4 << 20))
        if need <= budget or tile <= LANE:
            break
        tile = max(LANE, _round_up(tile // 2, LANE))
    return tile


# ---------------------------------------------------------------------------
# Forward passes
# ---------------------------------------------------------------------------
def gcn_forward_fused(x, a_hat, params, *, input_dtype=jnp.bfloat16):
    """Small-graph path: both GCNConv layers in one kernel launch."""
    n, c = x.shape[0], params[2].shape[1]
    adj_p, x_p, w1_p, b1_p, w2_p, b2_p = _prepare_padded(
        a_hat, x, params, n_multiple=SUBLANE, input_dtype=input_dtype)
    out = _two_layer_fused_call(adj_p, x_p, w1_p, b1_p, w2_p, b2_p)
    return out[:n, :c]


def gcn_forward_tiled(x, a_hat, params, *, input_dtype=jnp.bfloat16,
                      node_tile=None):
    """General path: (row, K)-tiled, block-sparse per-layer kernels."""
    w1, _, w2, _ = params
    n, c = x.shape[0], w2.shape[1]
    f_in_p = _round_up(x.shape[1], LANE)
    h_p = _round_up(w1.shape[1], LANE)
    c_p = _round_up(w2.shape[1], LANE)
    in_item = jnp.dtype(input_dtype).itemsize
    tile = _pick_tile(n, node_tile, max(f_in_p, h_p), max(h_p, c_p), in_item)

    adj_p, x_p, w1_p, b1_p, w2_p, b2_p = _prepare_padded(
        a_hat, x, params, n_multiple=tile, input_dtype=input_dtype)
    kmap, nnz = _block_sparsity(adj_p, tile)

    # Layer 1 emits input_dtype directly (no extra HBM pass between layers).
    h = gcn_conv(adj_p, x_p, w1_p, b1_p, kmap, nnz, apply_relu=True,
                 tile=tile, input_dtype=input_dtype, out_dtype=input_dtype)
    # F.dropout(p=0.5, training=False) -> identity (eval mode).
    out = gcn_conv(adj_p, h, w2_p, b2_p, kmap, nnz, apply_relu=False,
                   tile=tile, input_dtype=input_dtype, out_dtype=jnp.float32)
    return out[:n, :c]


def gcn_forward(x, a_hat, params, *, input_dtype=jnp.bfloat16, node_tile=None):
    """Auto-dispatch: fused kernel when the padded problem comfortably fits
    the chip's VMEM (from get_tpu_info), else the tiled path."""
    w1, _, w2, _ = params
    n = x.shape[0]
    n_pad = _round_up(n, SUBLANE)
    f_in_p = _round_up(x.shape[1], LANE)
    h_p = _round_up(w1.shape[1], LANE)
    c_p = _round_up(w2.shape[1], LANE)
    item = jnp.dtype(input_dtype).itemsize
    need = (n_pad * n_pad * item + n_pad * f_in_p * item
            + f_in_p * h_p * 4 + h_p * c_p * 4
            + n_pad * (2 * h_p + c_p + max(h_p, c_p)) * 4
            + (2 << 20))
    if need <= (2 * _vmem_capacity_bytes()) // 5:    # conservative headroom
        return gcn_forward_fused(x, a_hat, params, input_dtype=input_dtype)
    return gcn_forward_tiled(x, a_hat, params, input_dtype=input_dtype,
                             node_tile=node_tile)


# ---------------------------------------------------------------------------
# Graph / parameter construction
# ---------------------------------------------------------------------------
def build_normalized_adj(edge_index, num_nodes):
    """Dense D^-1/2 (A + I) D^-1/2 from edge_index (2, E), message src -> dst."""
    src, dst = edge_index[0], edge_index[1]
    adj = jnp.zeros((num_nodes, num_nodes), jnp.float32)
    adj = adj.at[dst, src].set(1.0)
    diag = jnp.arange(num_nodes)
    adj = adj.at[diag, diag].set(1.0)               # add self loops
    deg = adj.sum(axis=1)
    d_inv_sqrt = jnp.where(deg > 0, 1.0 / jnp.sqrt(deg), 0.0)
    return d_inv_sqrt[:, None] * adj * d_inv_sqrt[None, :]


def glorot(key, shape):
    fan_in, fan_out = shape
    limit = jnp.sqrt(6.0 / (fan_in + fan_out))
    return jax.random.uniform(key, shape, jnp.float32, -limit, limit)


def _reference(x, a_hat, params):
    w1, b1, w2, b2 = params
    h = jnp.maximum(a_hat @ x @ w1 + b1, 0.0)
    return a_hat @ h @ w2 + b2


if __name__ == "__main__":
    key = jax.random.PRNGKey(0)

    # ------------- Test A: small random graph -> fused path -----------------
    nA, fA, hA, cA, eA = 96, 48, 32, 8, 192
    kA = jax.random.split(key, 7)
    xA = jax.random.uniform(kA[0], (nA, fA), jnp.float32)
    xA = xA / jnp.maximum(xA.sum(axis=1, keepdims=True), 1e-12)
    srcA = jax.random.randint(kA[1], (eA,), 0, nA)
    dstA = jax.random.randint(kA[2], (eA,), 0, nA)
    eiA = jnp.stack([jnp.concatenate([srcA, dstA]),
                     jnp.concatenate([dstA, srcA])], axis=0)
    ahatA = build_normalized_adj(eiA, nA)
    w1A = glorot(kA[3], (fA, hA))
    b1A = 0.01 * jax.random.normal(kA[4], (hA,), jnp.float32)
    w2A = glorot(kA[5], (hA, cA))
    b2A = 0.01 * jax.random.normal(kA[6], (cA,), jnp.float32)
    pA = (w1A, b1A, w2A, b2A)
    refA = _reference(xA, ahatA, pA)

    outA32 = jax.block_until_ready(
        gcn_forward_fused(xA, ahatA, pA, input_dtype=jnp.float32))
    assert outA32.shape == (nA, cA)
    assert jnp.allclose(outA32, refA, atol=1e-3, rtol=1e-3)

    outAbf = jax.block_until_ready(gcn_forward_fused(xA, ahatA, pA))  # bf16 default
    assert jnp.allclose(outAbf, refA, atol=5e-2, rtol=5e-2)

    outAuto = jax.block_until_ready(gcn_forward(xA, ahatA, pA))       # dispatcher
    assert jnp.allclose(outAuto, refA, atol=5e-2, rtol=5e-2)

    # ------ Test B: community graph -> tiled, block-sparse, transform-first -
    nB, fB, hB, cB = 256, 200, 32, 8          # fB pads to 256 > 128 => XW-first
    half = nB // 2
    kB = jax.random.split(jax.random.PRNGKey(1), 10)
    xB = jax.random.uniform(kB[0], (nB, fB), jnp.float32)
    xB = xB / jnp.maximum(xB.sum(axis=1, keepdims=True), 1e-12)
    # Undirected edges inside each community + a few directed cross edges so
    # the two row stripes have different nonzero-block counts (exercises skip).
    s0 = jax.random.randint(kB[1], (256,), 0, half)
    d0 = jax.random.randint(kB[2], (256,), 0, half)
    s1 = jax.random.randint(kB[3], (256,), half, nB)
    d1 = jax.random.randint(kB[4], (256,), half, nB)
    sx = jax.random.randint(kB[5], (32,), 0, half)
    dx = jax.random.randint(kB[6], (32,), half, nB)
    srcB = jnp.concatenate([s0, d0, s1, d1, sx])
    dstB = jnp.concatenate([d0, s0, d1, s1, dx])
    eiB = jnp.stack([srcB, dstB], axis=0)
    ahatB = build_normalized_adj(eiB, nB)
    w1B = glorot(kB[7], (fB, hB))
    b1B = 0.01 * jax.random.normal(kB[8], (hB,), jnp.float32)
    w2B = glorot(kB[9], (hB, cB))
    b2B = 0.01 * jax.random.normal(jax.random.PRNGKey(2), (cB,), jnp.float32)
    pB = (w1B, b1B, w2B, b2B)
    refB = _reference(xB, ahatB, pB)

    # Sanity: with 128-node blocks the adjacency really is block-sparse,
    # i.e. at least one (tile, tile) block gets skipped by the kernel.
    _, nnzB = _block_sparsity(ahatB.astype(jnp.bfloat16), 128)
    assert int(nnzB.sum()) < int(nnzB.shape[0]) ** 2

    outB32 = jax.block_until_ready(
        gcn_forward_tiled(xB, ahatB, pB, input_dtype=jnp.float32, node_tile=128))
    assert outB32.shape == (nB, cB)
    assert jnp.allclose(outB32, refB, atol=1e-3, rtol=1e-3)

    outBbf = jax.block_until_ready(
        gcn_forward_tiled(xB, ahatB, pB, node_tile=128))               # bf16 default
    assert jnp.allclose(outBbf, refB, atol=5e-2, rtol=5e-2)

    print("KERNEL_OK")
</pallas_src>

<mosaic_0001>
module attributes {stable_mosaic.version = 11 : i64} {
  func.func @gcn_two_layer_kernel(%arg0: i32, %arg1: memref<96x96xf32, #tpu.memory_space<vmem>>, %arg2: memref<96x128xf32, #tpu.memory_space<vmem>>, %arg3: memref<128x128xf32, #tpu.memory_space<vmem>>, %arg4: memref<1x128xf32, #tpu.memory_space<vmem>>, %arg5: memref<128x128xf32, #tpu.memory_space<vmem>>, %arg6: memref<1x128xf32, #tpu.memory_space<vmem>>, %arg7: memref<96x128xf32, #tpu.memory_space<vmem>>) attributes {dimension_semantics = [#tpu.dimension_semantics<arbitrary>], iteration_bounds = array<i64: 1>, scalar_prefetch = 0 : i64, scratch_operands = 0 : i64, tpu.core_type = #tpu.core_type<tc>, window_params = [{pipeline_mode = #tpu.pipeline_mode<synchronous>, transform_indices = @transform_0, window_bounds = array<i64: 96, 96>}, {pipeline_mode = #tpu.pipeline_mode<synchronous>, transform_indices = @transform_1, window_bounds = array<i64: 96, 128>}, {pipeline_mode = #tpu.pipeline_mode<synchronous>, transform_indices = @transform_2, window_bounds = array<i64: 128, 128>}, {pipeline_mode = #tpu.pipeline_mode<synchronous>, transform_indices = @transform_3, window_bounds = array<i64: 1, 128>}, {pipeline_mode = #tpu.pipeline_mode<synchronous>, transform_indices = @transform_4, window_bounds = array<i64: 128, 128>}, {pipeline_mode = #tpu.pipeline_mode<synchronous>, transform_indices = @transform_5, window_bounds = array<i64: 1, 128>}, {pipeline_mode = #tpu.pipeline_mode<synchronous>, transform_indices = @transform_6, window_bounds = array<i64: 96, 128>}]} {
    %c0 = arith.constant 0 : index
    %c0_0 = arith.constant 0 : index
    %0 = vector.load %arg1[%c0, %c0_0] : memref<96x96xf32, #tpu.memory_space<vmem>>, vector<96x96xf32>
    %c0_1 = arith.constant 0 : index
    %c0_2 = arith.constant 0 : index
    %1 = vector.load %arg2[%c0_1, %c0_2] : memref<96x128xf32, #tpu.memory_space<vmem>>, vector<96x128xf32>
    %c0_3 = arith.constant 0 : index
    %c0_4 = arith.constant 0 : index
    %2 = vector.load %arg3[%c0_3, %c0_4] : memref<128x128xf32, #tpu.memory_space<vmem>>, vector<128x128xf32>
    %cst = arith.constant dense<0.000000e+00> : vector<96x128xf32>
    %3 = tpu.matmul %1, %2, %cst {dimension_numbers = #tpu.dot_dimension_numbers<[1], [0], [0], [1], [0, 0, 1, 1], [], []>} : vector<96x128xf32>, vector<128x128xf32>, vector<96x128xf32> -> vector<96x128xf32>
    %cst_5 = arith.constant dense<0.000000e+00> : vector<96x128xf32>
    %4 = tpu.matmul %0, %3, %cst_5 {dimension_numbers = #tpu.dot_dimension_numbers<[1], [0], [0], [1], [0, 0, 1, 1], [], []>} : vector<96x96xf32>, vector<96x128xf32>, vector<96x128xf32> -> vector<96x128xf32>
    %c0_6 = arith.constant 0 : index
    %c0_7 = arith.constant 0 : index
    %5 = vector.load %arg4[%c0_6, %c0_7] : memref<1x128xf32, #tpu.memory_space<vmem>>, vector<1x128xf32>
    %6 = vector.broadcast %5 : vector<1x128xf32> to vector<96x128xf32>
    %7 = arith.addf %4, %6 : vector<96x128xf32>
    %cst_8 = arith.constant 0.000000e+00 : f32
    %8 = vector.broadcast %cst_8 : f32 to vector<96x128xf32>
    %9 = arith.maximumf %7, %8 : vector<96x128xf32>
    %cst_9 = arith.constant dense<0.000000e+00> : vector<96x128xf32>
    %10 = tpu.matmul %0, %9, %cst_9 {dimension_numbers = #tpu.dot_dimension_numbers<[1], [0], [0], [1], [0, 0, 1, 1], [], []>} : vector<96x96xf32>, vector<96x128xf32>, vector<96x128xf32> -> vector<96x128xf32>
    %c0_10 = arith.constant 0 : index
    %c0_11 = arith.constant 0 : index
    %11 = vector.load %arg5[%c0_10, %c0_11] : memref<128x128xf32, #tpu.memory_space<vmem>>, vector<128x128xf32>
    %cst_12 = arith.constant dense<0.000000e+00> : vector<96x128xf32>
    %12 = tpu.matmul %10, %11, %cst_12 {dimension_numbers = #tpu.dot_dimension_numbers<[1], [0], [0], [1], [0, 0, 1, 1], [], []>} : vector<96x128xf32>, vector<128x128xf32>, vector<96x128xf32> -> vector<96x128xf32>
    %c0_13 = arith.constant 0 : index
    %c0_14 = arith.constant 0 : index
    %13 = vector.load %arg6[%c0_13, %c0_14] : memref<1x128xf32, #tpu.memory_space<vmem>>, vector<1x128xf32>
    %14 = vector.broadcast %13 : vector<1x128xf32> to vector<96x128xf32>
    %15 = arith.addf %12, %14 : vector<96x128xf32>
    %c0_15 = arith.constant 0 : index
    %c0_16 = arith.constant 0 : index
    %16 = vector.load %arg7[%c0_15, %c0_16] : memref<96x128xf32, #tpu.memory_space<vmem>>, vector<96x128xf32>
    tpu.vector_store %arg7[%c0_15, %c0_16], %15 {strides = array<i32>} : memref<96x128xf32, #tpu.memory_space<vmem>>, vector<96x128xf32>,
    return
  }
  func.func @transform_0(%arg0: i32) -> (i32, i32) {
    %c0_i32 = arith.constant 0 : i32
    %c0_i32_0 = arith.constant 0 : i32
    %c0_i32_1 = arith.constant 0 : i32
    return %c0_i32, %c0_i32_0 : i32, i32
  }
  func.func @transform_1(%arg0: i32) -> (i32, i32) {
    %c0_i32 = arith.constant 0 : i32
    %c0_i32_0 = arith.constant 0 : i32
    %c0_i32_1 = arith.constant 0 : i32
    return %c0_i32, %c0_i32_0 : i32, i32
  }
  func.func @transform_2(%arg0: i32) -> (i32, i32) {
    %c0_i32 = arith.constant 0 : i32
    %c0_i32_0 = arith.constant 0 : i32
    %c0_i32_1 = arith.constant 0 : i32
    return %c0_i32, %c0_i32_0 : i32, i32
  }
  func.func @transform_3(%arg0: i32) -> (i32, i32) {
    %c0_i32 = arith.constant 0 : i32
    %c0_i32_0 = arith.constant 0 : i32
    %c0_i32_1 = arith.constant 0 : i32
    return %c0_i32, %c0_i32_0 : i32, i32
  }
  func.func @transform_4(%arg0: i32) -> (i32, i32) {
    %c0_i32 = arith.constant 0 : i32
    %c0_i32_0 = arith.constant 0 : i32
    %c0_i32_1 = arith.constant 0 : i32
    return %c0_i32, %c0_i32_0 : i32, i32
  }
  func.func @transform_5(%arg0: i32) -> (i32, i32) {
    %c0_i32 = arith.constant 0 : i32
    %c0_i32_0 = arith.constant 0 : i32
    %c0_i32_1 = arith.constant 0 : i32
    return %c0_i32, %c0_i32_0 : i32, i32
  }
  func.func @transform_6(%arg0: i32) -> (i32, i32) {
    %c0_i32 = arith.constant 0 : i32
    %c0_i32_0 = arith.constant 0 : i32
    %c0_i32_1 = arith.constant 0 : i32
    return %c0_i32, %c0_i32_0 : i32, i32
  }
}

</mosaic_0001>

<bundles_post_ra>
// kernel: tpu_custom_call.1
= control target key start
LH: loop header
LB: loop body
LE: loop exit
PB: predicated region body
PF: predicated region fallthrough
CT: control target
= control target key end

     0   :  { %11 = vsyncpa [#allocation3], 0  ;;  %s1420_s0 = inlined_call_operand.hbm [shape: f32[96,96], index: 0, kind: input, shape index: {}]   ;;  %s1421_s1 = inlined_call_operand.hbm [shape: f32[96,128], index: 1, kind: input, shape index: {}]   ;;  %s1422_s2 = inlined_call_operand.hbm [shape: f32[128,128], index: 2, kind: input, shape index: {}]   ;;  %s1423_s3 = inlined_call_operand.vmem [shape: f32[1,128], index: 3, kind: input, shape index: {}]   ;;  %s1424_s4 = inlined_call_operand.hbm [shape: f32[128,128], index: 4, kind: input, shape index: {}]   ;;  %s1425_s5 = inlined_call_operand.vmem [shape: f32[1,128], index: 5, kind: input, shape index: {}]   ;;  %s1426_s6 = inlined_call_operand.hbm [shape: f32[96,128], index: 6, kind: output, shape index: {}]  }
   0x1   :  { %12 = vsyncpa [#allocation6], 0 }
   0x2   :  { %13 = vsyncpa [#allocation9], 0 }
   0x3   :  { %14 = vsyncpa [#allocation4], 0  ;;  %s1190_s21 = smov [#allocation5]   ;;  %s1191_s23 = smov [#allocation2]  }
   0x4   :  { %s32_s22 = sshll.u32 %s1190_s21, 4  ;;  %s20_s24 = sshll.u32 %s1191_s23, 4  ;;  %s33_s22 = int_to_ptr.vmem [resolvable:$true] %s32_s22  ;;  %s21_s24 = int_to_ptr.vmem [resolvable:$true] %s20_s24 }
   0x5   :  { %s1090_s25 = scalar_lea.vmem %s33_s22, 1536  ;;  %p1095_p1 = scmp.lt.s32.totalorder %s33_s22, %s33_s22 }
   0x6   :  { %p1091_p0 = scmp.ne.s32.totalorder %s33_s22, %s1090_s25  ;;  %p1096_p2 = scmp.lt.s32.totalorder %s1090_s25, %s1090_s25 }
   0x8   :  { %p1097_p3 = por %p1096_p2, %p1095_p1 }
   0xa   :  { %p1098_p4 = pnand %p1097_p3, %p1091_p0 }
   0xc   :  { %1101 = shalt.err (!%p1098_p4)
}
   0xd   :  { %s1192_s26 = smov 128   ;;  %s1193_s27 = smov 8  }
   0xe   :  { %38 = dma.hbm_to_vmem [thread:$0]  %s1421_s1, 1536, %s33_s22, [#allocation6], %s1192_s26, %s1192_s26, %s1193_s27  }
   0xf   :  { %s1110_s30 = scalar_lea.vmem %s21_s24, 1536  ;;  %p1115_p6 = scmp.lt.s32.totalorder %s21_s24, %s21_s24 }
  0x10   :  { %p1111_p5 = scmp.ne.s32.totalorder %s21_s24, %s1110_s30  ;;  %p1116_p7 = scmp.lt.s32.totalorder %s1110_s30, %s1110_s30 }
  0x12   :  { %p1117_p8 = por %p1116_p7, %p1115_p6 }
  0x14   :  { %p1118_p9 = pnand %p1117_p8, %p1111_p5 }
  0x16   :  { %1121 = shalt.err (!%p1118_p9)
}
  0x17   :  { %26 = dma.hbm_to_vmem [thread:$0]  %s1420_s0, 1536, %s21_s24, [#allocation3], %s1192_s26, %s1192_s26, %s1193_s27  }
  0x18   :  { %s1194_s9 = smov [#allocation7]   ;;  %s1195_s11 = smov [#allocation8]  }
  0x19   :  { %s44_s10 = sshll.u32 %s1194_s9, 4  ;;  %s58_s12 = sshll.u32 %s1195_s11, 4  ;;  %s45_s10 = int_to_ptr.vmem [resolvable:$true] %s44_s10  ;;  %s59_s12 = int_to_ptr.vmem [resolvable:$true] %s58_s12 }
  0x1a   :  { %s1130_s1 = scalar_lea.vmem %s45_s10, 2048  ;;  %p1135_p11 = scmp.lt.s32.totalorder %s45_s10, %s45_s10 }
  0x1b   :  { %p1131_p10 = scmp.ne.s32.totalorder %s45_s10, %s1130_s1  ;;  %p1136_p12 = scmp.lt.s32.totalorder %s1130_s1, %s1130_s1 }
  0x1d   :  { %p1137_p13 = por %p1136_p12, %p1135_p11 }
  0x1f   :  { %p1138_p0 = pnand %p1137_p13, %p1131_p10 }
  0x21   :  { %1141 = shalt.err (!%p1138_p0)
}
  0x22   :  { %50 = dma.hbm_to_vmem [thread:$0]  %s1422_s2, 2048, %s45_s10, [#allocation6], %s1192_s26, %s1192_s26, %s1193_s27  }
  0x23   :  { %s1150_s0 = scalar_lea.vmem %s59_s12, 2048  ;;  %p1155_p2 = scmp.lt.s32.totalorder %s59_s12, %s59_s12 }
  0x24   :  { %p1151_p1 = scmp.ne.s32.totalorder %s59_s12, %s1150_s0  ;;  %p1156_p3 = scmp.lt.s32.totalorder %s1150_s0, %s1150_s0 }
  0x26   :  { %p1157_p4 = por %p1156_p3, %p1155_p2 }
  0x28   :  { %p1158_p5 = pnand %p1157_p4, %p1151_p1 }
  0x2a   :  { %1161 = shalt.err (!%p1158_p5)
}
  0x2b   :  { %64 = dma.hbm_to_vmem [thread:$0]  %s1424_s4, 2048, %s59_s12, [#allocation9], %s1192_s26, %s1192_s26, %s1193_s27  }
  0x2c   :  { %1182 = dma.done.wait [#allocation3], 1536  }
  0x2d   :  { %1183 = vsyncadd [#allocation3], 4294965760 }
  0x2e   :  { %1184 = dma.done.wait [#allocation6], 3584  }
  0x2f   :  { %1185 = vsyncadd [#allocation6], 4294963712 }
  0x30   :  { %1186 = dma.done.wait [#allocation9], 2048  }
  0x31   :  { %1187 = vsyncadd [#allocation9], 4294965248  ;;  %v118_v0 = vld [vmem:[#allocation7 + $0x78] sm:$0xff]  ;;  %v117_v1 = vld [vmem:[#allocation7 + $0x70] sm:$0xff]  ;;  %vm251_vm0 = vcmask 785408  }
  0x32   :  { %859 = vmatprep.subr.mxu0 %v118_v0  ;;  %v116_v2 = vld [vmem:[#allocation7 + $0x68] sm:$0xff]  ;;  %v115_v3 = vld [vmem:[#allocation7 + $0x60] sm:$0xff]  ;;  %v114_v5 = vld [vmem:[#allocation7 + $0x58] sm:$0xff] }
  0x33   :  { %860 = vmatpush3.msra.mxu0 %v118_v0  ;;  %v91_v4 = vld [vmem:[#allocation5] sm:$0xff]  ;;  %v113_v6 = vld [vmem:[#allocation7 + $0x50] sm:$0xff]  ;;  %v112_v7 = vld [vmem:[#allocation7 + $0x48] sm:$0xff] }
  0x34   :  { %861 = vmatprep.subr.mxu0 %v117_v1  ;;  %891 = vmatprep.mubr.f32.mxu0 %v91_v4  ;;  %v111_v8 = vld [vmem:[#allocation7 + $0x40] sm:$0xff]  ;;  %v110_v9 = vld [vmem:[#allocation7 + $0x38] sm:$0xff]  ;;  %v109_v10 = vld [vmem:[#allocation7 + $0x30] sm:$0xff] }
  0x35   :  { %862 = vmatpush3.msra.mxu0 %v117_v1  ;;  %v108_v11 = vld [vmem:[#allocation7 + $0x28] sm:$0xff]  ;;  %v107_v12 = vld [vmem:[#allocation7 + $0x20] sm:$0xff]  ;;  %v106_v13 = vld [vmem:[#allocation7 + $0x18] sm:$0xff] }
  0x36   :  { %863 = vmatprep.subr.mxu0 %v116_v2  ;;  %v105_v14 = vld [vmem:[#allocation7 + $0x10] sm:$0xff]  ;;  %v104_v15 = vld [vmem:[#allocation7 + $0x8] sm:$0xff]  ;;  %v103_v16 = vld [vmem:[#allocation7] sm:$0xff] }
  0x37   :  { %864 = vmatpush3.msra.mxu0 %v116_v2  ;;  %v92_v17 = vld [vmem:[#allocation5 + $0x8] sm:$0xff]  ;;  %v93_v18 = vld [vmem:[#allocation5 + $0x10] sm:$0xff]  ;;  %v94_v19 = vld [vmem:[#allocation5 + $0x18] sm:$0xff] }
  0x38   :  { %865 = vmatprep.subr.mxu0 %v115_v3  ;;  %v95_v20 = vld [vmem:[#allocation5 + $0x20] sm:$0xff]  ;;  %v96_v21 = vld [vmem:[#allocation5 + $0x28] sm:$0xff]  ;;  %v97_v22 = vld [vmem:[#allocation5 + $0x30] sm:$0xff] }
  0x39   :  { %866 = vmatpush3.msra.mxu0 %v115_v3  ;;  %v98_v23 = vld [vmem:[#allocation5 + $0x38] sm:$0xff]  ;;  %v99_v24 = vld [vmem:[#allocation5 + $0x40] sm:$0xff]  ;;  %v100_v25 = vld [vmem:[#allocation5 + $0x48] sm:$0xff] }
  0x3a   :  { %867 = vmatprep.subr.mxu0 %v114_v5  ;;  %v101_v26 = vld [vmem:[#allocation5 + $0x50] sm:$0xff]  ;;  %v102_v27 = vld [vmem:[#allocation5 + $0x58] sm:$0xff]  ;;  %v79_v28 = vld [vmem:[#allocation2] sm:$0xff] }
  0x3b   :  { %868 = vmatpush3.msra.mxu0 %v114_v5  ;;  %933 = vmatprep.mubr.msk.f32.mxu1 %vm251_vm0, %v79_v28  ;;  %v1257_v41 = vld [vmem:[#allocation2 + $0x8] sm:$0xff]  ;;  %v1259_v42 = vld [vmem:[#allocation2 + $0x10] sm:$0xff]  ;;  %v1265_v43 = vld [vmem:[#allocation2 + $0x18] sm:$0xff] }
  0x3c   :  { %869 = vmatprep.subr.mxu0 %v113_v6  ;;  %v1267_v44 = vld [vmem:[#allocation2 + $0x20] sm:$0xff]  ;;  %v1273_v45 = vld [vmem:[#allocation2 + $0x28] sm:$0xff]  ;;  %v1275_v46 = vld [vmem:[#allocation2 + $0x30] sm:$0xff] }
  0x3d   :  { %870 = vmatpush3.msra.mxu0 %v113_v6  ;;  %v1281_v47 = vld [vmem:[#allocation2 + $0x38] sm:$0xff]  ;;  %v1283_v48 = vld [vmem:[#allocation2 + $0x40] sm:$0xff]  ;;  %v1289_v49 = vld [vmem:[#allocation2 + $0x48] sm:$0xff] }
  0x3e   :  { %871 = vmatprep.subr.mxu0 %v112_v7  ;;  %v1291_v50 = vld [vmem:[#allocation2 + $0x50] sm:$0xff]  ;;  %v1297_v51 = vld [vmem:[#allocation2 + $0x58] sm:$0xff]  ;;  %v1308_v54 = vld [vmem:[#allocation8 + $0x68] sm:$0xff] }
  0x3f   :  { %872 = vmatpush3.msra.mxu0 %v112_v7  ;;  %v1302_v52 = vld [vmem:[#allocation8 + $0x78] sm:$0xff]  ;;  %v1304_v53 = vld [vmem:[#allocation8 + $0x70] sm:$0xff]  ;;  %v1312_v55 = vld [vmem:[#allocation8 + $0x60] sm:$0xff] }
  0x40   :  { %873 = vmatprep.subr.mxu0 %v111_v8  ;;  %v1316_v56 = vld [vmem:[#allocation8 + $0x58] sm:$0xff]  ;;  %v1320_v57 = vld [vmem:[#allocation8 + $0x50] sm:$0xff]  ;;  %v1324_v58 = vld [vmem:[#allocation8 + $0x48] sm:$0xff] }
  0x41   :  { %874 = vmatpush3.msra.mxu0 %v111_v8  ;;  %v1328_v59 = vld [vmem:[#allocation8 + $0x40] sm:$0xff]  ;;  %v1332_v60 = vld [vmem:[#allocation8 + $0x38] sm:$0xff]  ;;  %v1336_v61 = vld [vmem:[#allocation8 + $0x30] sm:$0xff] }
  0x42   :  { %875 = vmatprep.subr.mxu0 %v110_v9  ;;  %v1340_v62 = vld [vmem:[#allocation8 + $0x28] sm:$0xff]  ;;  %v1344_v63 = vld [vmem:[#allocation8 + $0x20] sm:$0xff]  ;;  %v1348_v0 = vld [vmem:[#allocation8 + $0x18] sm:$0xff] }
  0x43   :  { %876 = vmatpush3.msra.mxu0 %v110_v9  ;;  %v1352_v1 = vld [vmem:[#allocation8 + $0x10] sm:$0xff] }
  0x44   :  { %877 = vmatprep.subr.mxu0 %v109_v10 }
  0x45   :  { %878 = vmatpush3.msra.mxu0 %v109_v10 }
  0x46   :  { %879 = vmatprep.subr.mxu0 %v108_v11 }
  0x47   :  { %880 = vmatpush3.msra.mxu0 %v108_v11 }
  0x48   :  { %881 = vmatprep.subr.mxu0 %v107_v12 }
  0x49   :  { %882 = vmatpush3.msra.mxu0 %v107_v12  ;;  %v729_v12 = vld [vmem:[%s1423_s3] ss:$0 sm:$0xff] }
  0x4a   :  { %883 = vmatprep.subr.mxu0 %v106_v13 }
  0x4b   :  { %884 = vmatpush3.msra.mxu0 %v106_v13 }
  0x4c   :  { %885 = vmatprep.subr.mxu0 %v105_v14 }
  0x4d   :  { %886 = vmatpush3.msra.mxu0 %v105_v14 }
  0x4e   :  { %887 = vmatprep.subr.mxu0 %v104_v15 }
  0x4f   :  { %888 = vmatpush3.msra.mxu0 %v104_v15 }
  0x50   :  { %889 = vmatprep.subr.mxu0 %v103_v16 }
  0x51   :  { %890 = vmatpush3.msra.mxu0 %v103_v16 }
  0x52   :  { %892 = vmatmul.mubr.f32.vlgmr.msra.gmra.mxu0 %v92_v17  ;;  %993 = vmatprep.subr.mxu0 %v1302_v52 }
  0x53   :  { %894 = vmatprep.mubr.f32.mxu0 %v93_v18  ;;  %994 = vmatpush3.msra.mxu0 %v1302_v52 }
  0x54   :  { %995 = vmatprep.subr.mxu0 %v1304_v53 }
  0x55   :  { %996 = vmatpush3.msra.mxu0 %v1304_v53 }
  0x56   :  { %895 = vmatmul.mubr.f32.gmra.mxu0 %v94_v19  ;;  %997 = vmatprep.subr.mxu0 %v1308_v54 }
  0x57   :  { %897 = vmatprep.mubr.f32.mxu0 %v95_v20  ;;  %998 = vmatpush3.msra.mxu0 %v1308_v54 }
  0x58   :  { %999 = vmatprep.subr.mxu0 %v1312_v55 }
  0x59   :  { %1000 = vmatpush3.msra.mxu0 %v1312_v55 }
  0x5a   :  { %898 = vmatmul.mubr.f32.gmra.mxu0 %v96_v21  ;;  %1001 = vmatprep.subr.mxu0 %v1316_v56 }
  0x5b   :  { %900 = vmatprep.mubr.f32.mxu0 %v97_v22  ;;  %1002 = vmatpush3.msra.mxu0 %v1316_v56 }
  0x5c   :  { %1003 = vmatprep.subr.mxu0 %v1320_v57 }
  0x5d   :  { %1004 = vmatpush3.msra.mxu0 %v1320_v57 }
  0x5e   :  { %901 = vmatmul.mubr.f32.gmra.mxu0 %v98_v23  ;;  %1005 = vmatprep.subr.mxu0 %v1324_v58 }
  0x5f   :  { %903 = vmatprep.mubr.f32.mxu0 %v99_v24  ;;  %1006 = vmatpush3.msra.mxu0 %v1324_v58 }
  0x60   :  { %1007 = vmatprep.subr.mxu0 %v1328_v59 }
  0x61   :  { %1008 = vmatpush3.msra.mxu0 %v1328_v59 }
  0x62   :  { %904 = vmatmul.mubr.f32.gmra.mxu0 %v100_v25  ;;  %1009 = vmatprep.subr.mxu0 %v1332_v60 }
  0x63   :  { %906 = vmatprep.mubr.f32.mxu0 %v101_v26  ;;  %1010 = vmatpush3.msra.mxu0 %v1332_v60 }
  0x64   :  { %1011 = vmatprep.subr.mxu0 %v1336_v61 }
  0x65   :  { %1012 = vmatpush3.msra.mxu0 %v1336_v61 }
  0x66   :  { %907 = vmatmul.mubr.f32.gmra.mxu0 %v102_v27  ;;  %1013 = vmatprep.subr.mxu0 %v1340_v62 }
  0x67   :  { %1014 = vmatpush3.msra.mxu0 %v1340_v62 }
  0x68   :  { %1015 = vmatprep.subr.mxu0 %v1344_v63 }
  0x69   :  { %1016 = vmatpush3.msra.mxu0 %v1344_v63 }
  0x6a   :  { %1017 = vmatprep.subr.mxu0 %v1348_v0 }
  0x6b   :  { %1018 = vmatpush3.msra.mxu0 %v1348_v0 }
  0x6c   :  { %1019 = vmatprep.subr.mxu0 %v1352_v1 }
  0x6d   :  { %1020 = vmatpush3.msra.mxu0 %v1352_v1 }
 0x112   :  { %v893_v29 = vpop.f32.mrf.mxu0 }
 0x114   :  { %v185_v30 = vpop.f32.mrf.mxu0 }
 0x116   :  { %v896_v31 = vpop.f32.mrf.mxu0 }
 0x118   :  { %v195_v32 = vpop.f32.mrf.mxu0 }
 0x11a   :  { %v899_v33 = vpop.f32.mrf.mxu0 }
 0x11c   :  { %v205_v34 = vpop.f32.mrf.mxu0 }
 0x11e   :  { %v902_v35 = vpop.f32.mrf.mxu0 }
 0x120   :  { %v215_v36 = vpop.f32.mrf.mxu0 }
 0x122   :  { %v905_v37 = vpop.f32.mrf.mxu0 }
 0x124   :  { %v225_v38 = vpop.f32.mrf.mxu0 }
 0x126   :  { %v908_v39 = vpop.f32.mrf.mxu0 }
 0x127   :  { %909 = vmatprep.subr.mxu1 %v908_v39 }
 0x128   :  { %v235_v40 = vpop.f32.mrf.mxu0  ;;  %910 = vmatpush3.msra.mxu1 %v908_v39  ;;  %v551_v39 = vld [vmem:[#allocation8 + $0x8] sm:$0xff] }
 0x129   :  { %911 = vmatprep.subr.mxu1 %v235_v40  ;;  %1021 = vmatprep.subr.mxu0 %v551_v39 }
 0x12a   :  { %912 = vmatpush3.msra.mxu1 %v235_v40  ;;  %1022 = vmatpush3.msra.mxu0 %v551_v39  ;;  %v550_v40 = vld [vmem:[#allocation8] sm:$0xff] }
 0x12b   :  { %913 = vmatprep.subr.mxu1 %v905_v37  ;;  %1023 = vmatprep.subr.mxu0 %v550_v40 }
 0x12c   :  { %914 = vmatpush3.msra.mxu1 %v905_v37  ;;  %1024 = vmatpush3.msra.mxu0 %v550_v40 }
 0x12d   :  { %915 = vmatprep.subr.mxu1 %v225_v38 }
 0x12e   :  { %916 = vmatpush3.msra.mxu1 %v225_v38 }
 0x12f   :  { %917 = vmatprep.subr.mxu1 %v902_v35 }
 0x130   :  { %918 = vmatpush3.msra.mxu1 %v902_v35 }
 0x131   :  { %919 = vmatprep.subr.mxu1 %v215_v36 }
 0x132   :  { %920 = vmatpush3.msra.mxu1 %v215_v36 }
 0x133   :  { %921 = vmatprep.subr.mxu1 %v899_v33 }
 0x134   :  { %922 = vmatpush3.msra.mxu1 %v899_v33 }
 0x135   :  { %923 = vmatprep.subr.mxu1 %v205_v34 }
 0x136   :  { %924 = vmatpush3.msra.mxu1 %v205_v34 }
 0x137   :  { %925 = vmatprep.subr.mxu1 %v896_v31 }
 0x138   :  { %926 = vmatpush3.msra.mxu1 %v896_v31 }
 0x139   :  { %927 = vmatprep.subr.mxu1 %v195_v32 }
 0x13a   :  { %928 = vmatpush3.msra.mxu1 %v195_v32 }
 0x13b   :  { %929 = vmatprep.subr.mxu1 %v893_v29 }
 0x13c   :  { %930 = vmatpush3.msra.mxu1 %v893_v29 }
 0x13d   :  { %931 = vmatprep.subr.mxu1 %v185_v30 }
 0x13e   :  { %932 = vmatpush3.msra.mxu1 %v185_v30 }
 0x13f   :  { %934 = vmatmul.mubr.msk.f32.vlgmr.msra.gmra.mxu1 %vm251_vm0, %v1257_v41 }
 0x140   :  { %936 = vmatprep.mubr.msk.f32.mxu1 %vm251_vm0, %v1259_v42 }
 0x143   :  { %937 = vmatmul.mubr.msk.f32.gmra.mxu1 %vm251_vm0, %v1265_v43 }
 0x144   :  { %939 = vmatprep.mubr.msk.f32.mxu1 %vm251_vm0, %v1267_v44 }
 0x147   :  { %940 = vmatmul.mubr.msk.f32.gmra.mxu1 %vm251_vm0, %v1273_v45 }
 0x148   :  { %942 = vmatprep.mubr.msk.f32.mxu1 %vm251_vm0, %v1275_v46 }
 0x14b   :  { %943 = vmatmul.mubr.msk.f32.gmra.mxu1 %vm251_vm0, %v1281_v47 }
 0x14c   :  { %945 = vmatprep.mubr.msk.f32.mxu1 %vm251_vm0, %v1283_v48 }
 0x14f   :  { %946 = vmatmul.mubr.msk.f32.gmra.mxu1 %vm251_vm0, %v1289_v49 }
 0x150   :  { %948 = vmatprep.mubr.msk.f32.mxu1 %vm251_vm0, %v1291_v50 }
 0x153   :  { %949 = vmatmul.mubr.msk.f32.gmra.mxu1 %vm251_vm0, %v1297_v51 }
 0x154   :  { %975 = vmatprep.mubr.msk.f32.mxu1 %vm251_vm0, %v79_v28 }
 0x1ff   :  { %v935_v2 = vpop.f32.mrf.mxu1 }
 0x200   :  { %v360_v33 = vadd.f32 %v935_v2, %v729_v12 }
 0x201   :  { %v354_v3 = vpop.f32.mrf.mxu1 }
 0x202   :  { %v355_v35 = vadd.f32 %v729_v12, %v354_v3  ;;  %v414_v37 = vmax.f32 %v360_v33, 0.0 }
 0x203   :  { %v938_v4 = vpop.f32.mrf.mxu1 }
 0x204   :  { %v370_v29 = vadd.f32 %v938_v4, %v729_v12  ;;  %v413_v38 = vmax.f32 %v355_v35, 0.0 }
 0x205   :  { %v364_v5 = vpop.f32.mrf.mxu1 }
 0x206   :  { %v365_v31 = vadd.f32 %v729_v12, %v364_v5  ;;  %v416_v34 = vmax.f32 %v370_v29, 0.0 }
 0x207   :  { %v941_v6 = vpop.f32.mrf.mxu1 }
 0x208   :  { %v380_v25 = vadd.f32 %v941_v6, %v729_v12  ;;  %v415_v36 = vmax.f32 %v365_v31, 0.0 }
 0x209   :  { %v374_v7 = vpop.f32.mrf.mxu1 }
 0x20a   :  { %v375_v27 = vadd.f32 %v729_v12, %v374_v7  ;;  %v418_v30 = vmax.f32 %v380_v25, 0.0 }
 0x20b   :  { %v944_v8 = vpop.f32.mrf.mxu1 }
 0x20c   :  { %v390_v21 = vadd.f32 %v944_v8, %v729_v12  ;;  %v417_v32 = vmax.f32 %v375_v27, 0.0 }
 0x20d   :  { %v384_v9 = vpop.f32.mrf.mxu1 }
 0x20e   :  { %v385_v23 = vadd.f32 %v729_v12, %v384_v9  ;;  %v420_v26 = vmax.f32 %v390_v21, 0.0 }
 0x20f   :  { %v947_v10 = vpop.f32.mrf.mxu1 }
 0x210   :  { %v400_v16 = vadd.f32 %v947_v10, %v729_v12  ;;  %v419_v28 = vmax.f32 %v385_v23, 0.0 }
 0x211   :  { %v394_v11 = vpop.f32.mrf.mxu1 }
 0x212   :  { %v395_v19 = vadd.f32 %v729_v12, %v394_v11  ;;  %v422_v22 = vmax.f32 %v400_v16, 0.0 }
 0x213   :  { %v950_v13 = vpop.f32.mrf.mxu1 }
 0x214   :  { %v410_v14 = vadd.f32 %v950_v13, %v729_v12  ;;  %v421_v24 = vmax.f32 %v395_v19, 0.0 }
 0x215   :  { %v404_v15 = vpop.f32.mrf.mxu1 }
 0x216   :  { %v424_v17 = vmax.f32 %v410_v14, 0.0  ;;  %v405_v18 = vadd.f32 %v729_v12, %v404_v15 }
 0x218   :  { %v423_v20 = vmax.f32 %v405_v18, 0.0  ;;  %951 = vmatprep.subr.mxu1 %v424_v17 }
 0x219   :  { %952 = vmatpush3.msra.mxu1 %v424_v17 }
 0x21a   :  { %953 = vmatprep.subr.mxu1 %v423_v20 }
 0x21b   :  { %954 = vmatpush3.msra.mxu1 %v423_v20 }
 0x21c   :  { %955 = vmatprep.subr.mxu1 %v422_v22 }
 0x21d   :  { %956 = vmatpush3.msra.mxu1 %v422_v22 }
 0x21e   :  { %957 = vmatprep.subr.mxu1 %v421_v24 }
 0x21f   :  { %958 = vmatpush3.msra.mxu1 %v421_v24 }
 0x220   :  { %959 = vmatprep.subr.mxu1 %v420_v26 }
 0x221   :  { %960 = vmatpush3.msra.mxu1 %v420_v26 }
 0x222   :  { %961 = vmatprep.subr.mxu1 %v419_v28 }
 0x223   :  { %962 = vmatpush3.msra.mxu1 %v419_v28 }
 0x224   :  { %963 = vmatprep.subr.mxu1 %v418_v30 }
 0x225   :  { %964 = vmatpush3.msra.mxu1 %v418_v30 }
 0x226   :  { %965 = vmatprep.subr.mxu1 %v417_v32 }
 0x227   :  { %966 = vmatpush3.msra.mxu1 %v417_v32 }
 0x228   :  { %967 = vmatprep.subr.mxu1 %v416_v34 }
 0x229   :  { %968 = vmatpush3.msra.mxu1 %v416_v34 }
 0x22a   :  { %969 = vmatprep.subr.mxu1 %v415_v36 }
 0x22b   :  { %970 = vmatpush3.msra.mxu1 %v415_v36 }
 0x22c   :  { %971 = vmatprep.subr.mxu1 %v414_v37 }
 0x22d   :  { %972 = vmatpush3.msra.mxu1 %v414_v37 }
 0x22e   :  { %973 = vmatprep.subr.mxu1 %v413_v38 }
 0x22f   :  { %974 = vmatpush3.msra.mxu1 %v413_v38 }
 0x230   :  { %976 = vmatmul.mubr.msk.f32.vlgmr.msra.gmra.mxu1 %vm251_vm0, %v1257_v41  ;;  %1043 = vmatprep.subr.mxu1 %v1302_v52 }
 0x231   :  { %978 = vmatprep.mubr.msk.f32.mxu1 %vm251_vm0, %v1259_v42  ;;  %1059 = vmatpush3.msra.mxu1 %v1302_v52 }
 0x232   :  { %1044 = vmatprep.subr.mxu1 %v1304_v53 }
 0x233   :  { %1060 = vmatpush3.msra.mxu1 %v1304_v53  ;;  %v754_v53 = vld [vmem:[%s1425_s5] ss:$0 sm:$0xff]  ;;  %s1196_s5 = smov [#allocation10]  }
 0x234   :  { %979 = vmatmul.mubr.msk.f32.gmra.mxu1 %vm251_vm0, %v1265_v43  ;;  %1045 = vmatprep.subr.mxu1 %v1308_v54  ;;  %s715_s18 = sshll.u32 %s1196_s5, 4  ;;  %s716_s18 = int_to_ptr.vmem [resolvable:$true] %s715_s18 }
 0x235   :  { %981 = vmatprep.mubr.msk.f32.mxu1 %vm251_vm0, %v1267_v44  ;;  %1061 = vmatpush3.msra.mxu1 %v1308_v54  ;;  %s1162_s19 = scalar_lea.vmem %s716_s18, 1536  ;;  %p1167_p7 = scmp.lt.s32.totalorder %s716_s18, %s716_s18 }
 0x236   :  { %1046 = vmatprep.subr.mxu1 %v1312_v55  ;;  %p1163_p6 = scmp.ne.s32.totalorder %s716_s18, %s1162_s19  ;;  %p1168_p8 = scmp.lt.s32.totalorder %s1162_s19, %s1162_s19 }
 0x237   :  { %1062 = vmatpush3.msra.mxu1 %v1312_v55 }
 0x238   :  { %982 = vmatmul.mubr.msk.f32.gmra.mxu1 %vm251_vm0, %v1273_v45  ;;  %1047 = vmatprep.subr.mxu1 %v1316_v56  ;;  %p1169_p9 = por %p1168_p8, %p1167_p7 }
 0x239   :  { %984 = vmatprep.mubr.msk.f32.mxu1 %vm251_vm0, %v1275_v46  ;;  %1063 = vmatpush3.msra.mxu1 %v1316_v56 }
 0x23a   :  { %1048 = vmatprep.subr.mxu1 %v1320_v57  ;;  %p1170_p10 = pnand %p1169_p9, %p1163_p6 }
 0x23b   :  { %1064 = vmatpush3.msra.mxu1 %v1320_v57 }
 0x23c   :  { %985 = vmatmul.mubr.msk.f32.gmra.mxu1 %vm251_vm0, %v1281_v47  ;;  %1049 = vmatprep.subr.mxu1 %v1324_v58 }
 0x23d   :  { %987 = vmatprep.mubr.msk.f32.mxu1 %vm251_vm0, %v1283_v48  ;;  %1065 = vmatpush3.msra.mxu1 %v1324_v58 }
 0x23e   :  { %1050 = vmatprep.subr.mxu1 %v1328_v59 }
 0x23f   :  { %1066 = vmatpush3.msra.mxu1 %v1328_v59 }
 0x240   :  { %988 = vmatmul.mubr.msk.f32.gmra.mxu1 %vm251_vm0, %v1289_v49  ;;  %1051 = vmatprep.subr.mxu1 %v1332_v60 }
 0x241   :  { %990 = vmatprep.mubr.msk.f32.mxu1 %vm251_vm0, %v1291_v50  ;;  %1067 = vmatpush3.msra.mxu1 %v1332_v60 }
 0x242   :  { %1052 = vmatprep.subr.mxu1 %v1336_v61 }
 0x243   :  { %1068 = vmatpush3.msra.mxu1 %v1336_v61 }
 0x244   :  { %991 = vmatmul.mubr.msk.f32.gmra.mxu1 %vm251_vm0, %v1297_v51  ;;  %1053 = vmatprep.subr.mxu1 %v1340_v62 }
 0x245   :  { %1069 = vmatpush3.msra.mxu1 %v1340_v62 }
 0x246   :  { %1054 = vmatprep.subr.mxu1 %v1344_v63 }
 0x247   :  { %1070 = vmatpush3.msra.mxu1 %v1344_v63 }
 0x248   :  { %1055 = vmatprep.subr.mxu1 %v1348_v0 }
 0x249   :  { %1071 = vmatpush3.msra.mxu1 %v1348_v0 }
 0x24a   :  { %1056 = vmatprep.subr.mxu1 %v1352_v1 }
 0x24b   :  { %1072 = vmatpush3.msra.mxu1 %v1352_v1 }
 0x24c   :  { %1057 = vmatprep.subr.mxu1 %v551_v39 }
 0x24d   :  { %1073 = vmatpush3.msra.mxu1 %v551_v39 }
 0x24e   :  { %1058 = vmatprep.subr.mxu1 %v550_v40 }
 0x24f   :  { %1074 = vmatpush3.msra.mxu1 %v550_v40 }
 0x2f0   :  { %v977_v41 = vpop.f32.mrf.mxu1 }
 0x2f2   :  { %v491_v42 = vpop.f32.mrf.mxu1 }
 0x2f3   :  { %1025 = vmatprep.mubr.f32.mxu0 %v491_v42 }
 0x2f4   :  { %v980_v43 = vpop.f32.mrf.mxu1  ;;  %1026 = vmatmul.mubr.f32.vlgmr.msra.gmra.mxu0 %v977_v41 }
 0x2f6   :  { %v501_v44 = vpop.f32.mrf.mxu1 }
 0x2f7   :  { %1028 = vmatprep.mubr.f32.mxu0 %v501_v44 }
 0x2f8   :  { %v983_v45 = vpop.f32.mrf.mxu1  ;;  %1029 = vmatmul.mubr.f32.gmra.mxu0 %v980_v43 }
 0x2fa   :  { %v511_v46 = vpop.f32.mrf.mxu1 }
 0x2fb   :  { %1031 = vmatprep.mubr.f32.mxu0 %v511_v46 }
 0x2fc   :  { %v986_v47 = vpop.f32.mrf.mxu1  ;;  %1032 = vmatmul.mubr.f32.gmra.mxu0 %v983_v45 }
 0x2fe   :  { %v521_v48 = vpop.f32.mrf.mxu1 }
 0x2ff   :  { %1034 = vmatprep.mubr.f32.mxu0 %v521_v48 }
 0x300   :  { %v989_v49 = vpop.f32.mrf.mxu1  ;;  %1035 = vmatmul.mubr.f32.gmra.mxu0 %v986_v47 }
 0x302   :  { %v531_v50 = vpop.f32.mrf.mxu1 }
 0x303   :  { %1037 = vmatprep.mubr.f32.mxu0 %v531_v50 }
 0x304   :  { %v992_v51 = vpop.f32.mrf.mxu1  ;;  %1038 = vmatmul.mubr.f32.gmra.mxu0 %v989_v49 }
 0x306   :  { %v541_v52 = vpop.f32.mrf.mxu1 }
 0x307   :  { %1040 = vmatprep.mubr.f32.mxu1 %v541_v52 }
 0x308   :  { %1041 = vmatmul.mubr.f32.vlgmr.msra.gmra.mxu1 %v992_v51 }
 0x3b4   :  { %v1027_v54 = vpop.f32.mrf.mxu0 }
 0x3b5   :  { %v645_v55 = vadd.f32 %v1027_v54, %v754_v53 }
 0x3b6   :  { %v639_v56 = vpop.f32.mrf.mxu0 }
 0x3b7   :  { %699 = vst [vmem:[#allocation10 + $0x8] sm:$0xff] %v645_v55  ;;  %v640_v57 = vadd.f32 %v754_v53, %v639_v56 }
 0x3b8   :  { %v1030_v58 = vpop.f32.mrf.mxu0 }
 0x3b9   :  { %698 = vst [vmem:[#allocation10] sm:$0xff] %v640_v57  ;;  %v655_v59 = vadd.f32 %v1030_v58, %v754_v53 }
 0x3ba   :  { %v649_v60 = vpop.f32.mrf.mxu0 }
 0x3bb   :  { %701 = vst [vmem:[#allocation10 + $0x18] sm:$0xff] %v655_v59  ;;  %v650_v61 = vadd.f32 %v754_v53, %v649_v60 }
 0x3bc   :  { %v1033_v62 = vpop.f32.mrf.mxu0 }
 0x3bd   :  { %700 = vst [vmem:[#allocation10 + $0x10] sm:$0xff] %v650_v61  ;;  %v665_v63 = vadd.f32 %v1033_v62, %v754_v53 }
 0x3be   :  { %v659_v0 = vpop.f32.mrf.mxu0 }
 0x3bf   :  { %703 = vst [vmem:[#allocation10 + $0x28] sm:$0xff] %v665_v63  ;;  %v660_v1 = vadd.f32 %v754_v53, %v659_v0 }
 0x3c0   :  { %v1036_v2 = vpop.f32.mrf.mxu0 }
 0x3c1   :  { %702 = vst [vmem:[#allocation10 + $0x20] sm:$0xff] %v660_v1  ;;  %v675_v3 = vadd.f32 %v1036_v2, %v754_v53 }
 0x3c2   :  { %v669_v4 = vpop.f32.mrf.mxu0 }
 0x3c3   :  { %705 = vst [vmem:[#allocation10 + $0x38] sm:$0xff] %v675_v3  ;;  %v670_v5 = vadd.f32 %v754_v53, %v669_v4 }
 0x3c4   :  { %v1039_v6 = vpop.f32.mrf.mxu0 }
 0x3c5   :  { %704 = vst [vmem:[#allocation10 + $0x30] sm:$0xff] %v670_v5  ;;  %v685_v7 = vadd.f32 %v1039_v6, %v754_v53 }
 0x3c6   :  { %v679_v8 = vpop.f32.mrf.mxu0 }
 0x3c7   :  { %707 = vst [vmem:[#allocation10 + $0x48] sm:$0xff] %v685_v7  ;;  %v680_v9 = vadd.f32 %v754_v53, %v679_v8 }
 0x3c8   :  { %v1042_v10 = vpop.f32.mrf.mxu1 }
 0x3c9   :  { %706 = vst [vmem:[#allocation10 + $0x40] sm:$0xff] %v680_v9  ;;  %v695_v11 = vadd.f32 %v1042_v10, %v754_v53 }
 0x3ca   :  { %v689_v12 = vpop.f32.mrf.mxu1 }
 0x3cb   :  { %709 = vst [vmem:[#allocation10 + $0x58] sm:$0xff] %v695_v11  ;;  %v690_v13 = vadd.f32 %v754_v53, %v689_v12 }
 0x3cd   :  { %708 = vst [vmem:[#allocation10 + $0x50] sm:$0xff] %v690_v13 }
 0x3ce   :  { %1173 = shalt.err (!%p1170_p10)
}
 0x3cf   :  { %721 = dma.vmem_to_hbm [thread:$0]  %s716_s18, 1536, %s1426_s6, [#allocation4], %s1192_s26, %s1192_s26, %s1193_s27  }
 0x3d0   :  { %1188 = dma.done.wait [#allocation4], 1536  }
 0x3d1   :  { %1189 = vsyncadd [#allocation4], 4294965760 }
 0x3d2   :  { %725 = vsyncpa [#allocation3], 1 }
 0x3d3   :  { %726 = vsyncpa [#allocation6], 1 }
 0x3d4   :  { %727 = vsyncpa [#allocation9], 1 }
 0x3d5   :  { %728 = vsyncpa [#allocation4], 1 }

</bundles_post_ra>
